<compile_context>
chip_gen: v7x
topology: tpu7x:2x2x1
jax: 0.10.0
libtpu: 0.0.40
codegen_flags: <defaults>
</compile_context>

<pallas_src>
import math
import numpy as np

import jax
import jax.numpy as jnp
from jax import lax
from jax.experimental import pallas as pl
from jax.experimental.pallas import tpu as pltpu


# ---------------------------------------------------------------------------
# Pallas kernel: out_tile = one_hot(idx_tile, c_pad) @ table
# ---------------------------------------------------------------------------
def fixed_embedding_kernel(idx_ref, tab_ref, o_ref):
    idx = idx_ref[...]                                   # (tm, 1) int32
    tm = idx.shape[0]
    c_pad = tab_ref.shape[0]
    col = lax.broadcasted_iota(jnp.int32, (tm, c_pad), 1)
    oneh = (col == idx).astype(tab_ref.dtype)            # (tm, c_pad) one-hot
    o_ref[...] = jnp.dot(oneh, tab_ref[...],
                         preferred_element_type=jnp.float32).astype(o_ref.dtype)


# ---------------------------------------------------------------------------
# Fixed sin/cos table (matches the PyTorch FixedEmbedding constructor)
# ---------------------------------------------------------------------------
def fixed_embedding_table(c_in, d_model):
    pos = np.arange(c_in, dtype=np.float32)[:, None]
    div = np.exp(np.arange(0, d_model, 2, dtype=np.float32)
                 * -(math.log(10000.0) / d_model))
    w = np.zeros((c_in, d_model), dtype=np.float32)
    w[:, 0::2] = np.sin(pos * div)
    w[:, 1::2] = np.cos(pos * div)
    return jnp.asarray(w)


def _round_up(v, m):
    return (v + m - 1) // m * m


def _cdiv(a, b):
    return -(-a // b)


_TM_MAX = 2048  # max rows per tile; keeps the VMEM footprint modest on v7x


def _choose_row_tiling(rows):
    """Balanced tiles: rows_pad - rows < tm, >=2 tiles once rows >= 512."""
    n_tiles = max(_cdiv(rows, _TM_MAX), 1)
    if rows >= 512:
        n_tiles = max(n_tiles, 2)          # feed both TensorCores on v7x megacore
    tm = _round_up(_cdiv(rows, n_tiles), 8)
    rows_pad = _round_up(rows, tm)
    grid = rows_pad // tm
    return tm, rows_pad, grid


# ---------------------------------------------------------------------------
# Wrapper
# ---------------------------------------------------------------------------
def fixed_embedding(x_idx, table, out_dtype=None):
    """x_idx: int array of indices (any leading shape); table: (c_in, d_model).

    out_dtype: output / table compute dtype.  Default keeps the table dtype
    (f32, matching PyTorch).  Pass jnp.bfloat16 to halve HBM write traffic on
    this output-write-bound kernel (gather stays exact at bf16 table precision).
    """
    c_in, d_model = table.shape
    out_dtype = table.dtype if out_dtype is None else out_dtype
    lead_shape = x_idx.shape
    rows = int(np.prod(lead_shape)) if lead_shape else 1

    # Pad the table: rows to a sublane multiple, cols to a lane-dense 128-multiple.
    # Do NOT pad c_pad up to 128: the matmul is a rounding error next to the
    # output DMA and a bigger K only multiplies the one-hot VALU work.
    c_pad = _round_up(c_in, 8)
    d_pad = _round_up(d_model, 128)
    tab_p = jnp.zeros((c_pad, d_pad), out_dtype).at[:c_in, :d_model].set(
        table.astype(out_dtype))

    tm, rows_pad, grid_rows = _choose_row_tiling(rows)

    idx = x_idx.reshape(rows).astype(jnp.int32)
    if rows_pad != rows:
        # Padded rows gather index 0 (valid) and are sliced off below.
        idx = jnp.pad(idx, (0, rows_pad - rows))
    idx2 = idx.reshape(rows_pad, 1)

    out_dsize = jnp.dtype(out_dtype).itemsize
    tab_dsize = jnp.dtype(tab_p.dtype).itemsize

    # Real VMEM footprint (double-buffered output + lane-padded idx tile +
    # table + f32 one-hot intermediate) + headroom, capped < v7x's 64 MiB.
    vmem_need = (2 * tm * d_pad * out_dsize        # output double buffer
                 + 2 * tm * 128 * 4                # (tm,1) int32 idx, lane-padded
                 + 2 * c_pad * d_pad * tab_dsize   # resident table buffers
                 + tm * c_pad * 4)                 # one-hot intermediate
    vmem_limit = int(min(max(vmem_need + (8 << 20), 16 << 20), 48 << 20))

    cost = pl.CostEstimate(
        flops=2 * rows_pad * c_pad * d_pad,
        bytes_accessed=(rows_pad * 4                       # indices
                        + rows_pad * d_pad * out_dsize     # output write
                        + c_pad * d_pad * tab_dsize),      # table read
        transcendentals=0,
    )

    out = pl.pallas_call(
        fixed_embedding_kernel,
        out_shape=jax.ShapeDtypeStruct((rows_pad, d_pad), out_dtype),
        grid_spec=pltpu.PrefetchScalarGridSpec(
            num_scalar_prefetch=0,
            grid=(grid_rows,),
            in_specs=[
                pl.BlockSpec((tm, 1), lambda i: (i, 0)),         # raw int32 indices
                pl.BlockSpec((c_pad, d_pad), lambda i: (0, 0)),  # resident table
            ],
            out_specs=pl.BlockSpec((tm, d_pad), lambda i: (i, 0)),
        ),
        compiler_params=pltpu.CompilerParams(
            dimension_semantics=("parallel",),
            vmem_limit_bytes=vmem_limit,
        ),
        cost_estimate=cost,
    )(idx2, tab_p)

    # Only slice if padding was actually added (avoids an extra output copy).
    if rows_pad != rows or d_pad != d_model:
        out = out[:rows, :d_model]
    return out.reshape(*lead_shape, d_model)

# TODO(synk): if this feeds a TemporalEmbedding-style sum of several
#             FixedEmbeddings with the same d_model, fuse them (stacked table,
#             offset indices, one accumulator, single output write).


# ---------------------------------------------------------------------------
# Pure-JAX reference (silent correctness check)
# ---------------------------------------------------------------------------
def reference(x_idx, table):
    return jnp.take(table, x_idx, axis=0)


if __name__ == "__main__":
    # FixedEmbedding is used as e.g. hour_embed = FixedEmbedding(24, d_model)
    # on integer time-feature indices of shape (B, L).
    B, L, c_in, d_model = 2, 8, 24, 32

    key = jax.random.PRNGKey(0)
    x_idx = jax.random.randint(key, (B, L), 0, c_in, dtype=jnp.int32)

    table = fixed_embedding_table(c_in, d_model)
    ref = reference(x_idx, table)

    # f32 path: must match the PyTorch module exactly.
    out = fixed_embedding(x_idx, table)
    out = jax.block_until_ready(out)
    assert out.shape == (B, L, d_model)
    assert out.dtype == jnp.float32
    assert jnp.allclose(out, ref, rtol=1e-6, atol=1e-6)

    # bf16 fast path: same gather, table values rounded to bf16.
    out_bf16 = fixed_embedding(x_idx, table, out_dtype=jnp.bfloat16)
    out_bf16 = jax.block_until_ready(out_bf16)
    assert out_bf16.dtype == jnp.bfloat16
    assert jnp.allclose(out_bf16.astype(jnp.float32), ref, rtol=1e-2, atol=1e-2)

    print("KERNEL_OK")
</pallas_src>

<mosaic_0001>
module attributes {stable_mosaic.version = 11 : i64} {
  func.func @fixed_embedding_kernel(%arg0: i32, %arg1: memref<16x1xi32, #tpu.memory_space<vmem>>, %arg2: memref<24x128xf32, #tpu.memory_space<vmem>>, %arg3: memref<16x128xf32, #tpu.memory_space<vmem>>) attributes {dimension_semantics = [#tpu.dimension_semantics<parallel>], iteration_bounds = array<i64: 1>, scalar_prefetch = 0 : i64, scratch_operands = 0 : i64, tpu.core_type = #tpu.core_type<tc>, window_params = [{transform_indices = @transform_0, window_bounds = array<i64: 16, 1>}, {pipeline_mode = #tpu.pipeline_mode<synchronous>, transform_indices = @transform_1, window_bounds = array<i64: 24, 128>}, {transform_indices = @transform_2, window_bounds = array<i64: 16, 128>}]} {
    %c0 = arith.constant 0 : index
    %c0_0 = arith.constant 0 : index
    %0 = vector.load %arg1[%c0, %c0_0] : memref<16x1xi32, #tpu.memory_space<vmem>>, vector<16x1xi32>
    %1 = tpu.iota {dimensions = array<i32: 1>} : vector<16x24xi32>
    %2 = vector.broadcast %0 : vector<16x1xi32> to vector<16x24xi32>
    %3 = arith.cmpi eq, %1, %2 : vector<16x24xi32>
    %4 = arith.extui %3 : vector<16x24xi1> to vector<16x24xi32>
    %5 = arith.sitofp %4 : vector<16x24xi32> to vector<16x24xf32>
    %c0_1 = arith.constant 0 : index
    %c0_2 = arith.constant 0 : index
    %6 = vector.load %arg2[%c0_1, %c0_2] : memref<24x128xf32, #tpu.memory_space<vmem>>, vector<24x128xf32>
    %cst = arith.constant dense<0.000000e+00> : vector<16x128xf32>
    %7 = tpu.matmul %5, %6, %cst {dimension_numbers = #tpu.dot_dimension_numbers<[1], [0], [0], [1], [0, 0, 1, 1], [], []>} : vector<16x24xf32>, vector<24x128xf32>, vector<16x128xf32> -> vector<16x128xf32>
    %c0_3 = arith.constant 0 : index
    %c0_4 = arith.constant 0 : index
    %8 = vector.load %arg3[%c0_3, %c0_4] : memref<16x128xf32, #tpu.memory_space<vmem>>, vector<16x128xf32>
    tpu.vector_store %arg3[%c0_3, %c0_4], %7 {strides = array<i32>} : memref<16x128xf32, #tpu.memory_space<vmem>>, vector<16x128xf32>,
    return
  }
  func.func @transform_0(%arg0: i32) -> (i32, i32) {
    %c0_i32 = arith.constant 0 : i32
    %c0_i32_0 = arith.constant 0 : i32
    return %arg0, %c0_i32 : i32, i32
  }
  func.func @transform_1(%arg0: i32) -> (i32, i32) {
    %c0_i32 = arith.constant 0 : i32
    %c0_i32_0 = arith.constant 0 : i32
    %c0_i32_1 = arith.constant 0 : i32
    return %c0_i32, %c0_i32_0 : i32, i32
  }
  func.func @transform_2(%arg0: i32) -> (i32, i32) {
    %c0_i32 = arith.constant 0 : i32
    %c0_i32_0 = arith.constant 0 : i32
    return %arg0, %c0_i32 : i32, i32
  }
}

</mosaic_0001>

<bundles_post_ra>
// kernel: tpu_custom_call.1
= control target key start
LH: loop header
LB: loop body
LE: loop exit
PB: predicated region body
PF: predicated region fallthrough
CT: control target
= control target key end

     0   :  { %7 = vsyncpa [#allocation3], 0  ;;  %s280_s0 = inlined_call_operand.vmem [shape: s32[16,1], index: 0, kind: input, shape index: {}]   ;;  %s281_s1 = inlined_call_operand.hbm [shape: f32[24,128], index: 1, kind: input, shape index: {}]   ;;  %s282_s2 = inlined_call_operand.hbm [shape: f32[16,128], index: 2, kind: output, shape index: {}]  }
   0x1   :  { %8 = vsyncpa [#allocation4], 0  ;;  %s223_s9 = smov [#allocation2]   ;;  %s175_s13 = scalar_lea.hbm %s281_s1, 384 }
   0x2   :  { %s16_s10 = sshll.u32 %s223_s9, 4  ;;  %p176_p0 = scmp.ne.s32.totalorder %s281_s1, %s175_s13  ;;  %s17_s10 = int_to_ptr.vmem [resolvable:$true] %s16_s10 }
   0x3   :  { %p179_p1 = scmp.lt.u32.totalorder %s175_s13, %s281_s1 }
   0x5   :  { %p181_p2 = pnand %p179_p1, %p176_p0 }
   0x7   :  { %184 = shalt.err (!%p181_p2)
}
   0x8   :  { %s185_s18 = scalar_lea.vmem %s17_s10, 384  ;;  %p190_p4 = scmp.lt.s32.totalorder %s17_s10, %s17_s10 }
   0x9   :  { %p186_p3 = scmp.ne.s32.totalorder %s17_s10, %s185_s18  ;;  %p191_p5 = scmp.lt.s32.totalorder %s185_s18, %s185_s18 }
   0xb   :  { %p192_p6 = por %p191_p5, %p190_p4 }
   0xd   :  { %p193_p7 = pnand %p192_p6, %p186_p3 }
   0xf   :  { %196 = shalt.err (!%p193_p7)
}
  0x10   :  { %s224_s19 = smov 128   ;;  %s225_s20 = smov 8  }
  0x11   :  { %22 = dma.hbm_to_vmem [thread:$0]  %s281_s1, 384, %s17_s10, [#allocation3], %s224_s19, %s224_s19, %s225_s20  }
  0x12   :  { %219 = dma.done.wait [#allocation3], 384  }
  0x13   :  { %220 = vsyncadd [#allocation3], 4294966912  ;;  %v226_v0 = vmov 0   ;;  %v26_v1 = vld [vmem:[%s280_s0] sm:$0xff]  ;;  %v43_v3 = vld [vmem:[#allocation2 + $0x8] sm:$0xff]  ;;  %v28_v7 = vlaneseq  ;;  %vm45_vm0 = vcmask 195584  }
  0x14   :  { %174 = vset.pattern.permute.xlu0 %v226_v0  ;;  %v42_v2 = vld [vmem:[#allocation2] sm:$0xff]  ;;  %v27_v4 = vld [vmem:[%s280_s0 + $0x8] sm:$0xff]  ;;  %v44_v6 = vld [vmem:[#allocation2 + $0x10] sm:$0xff]  ;;  %v227_v10 = vmov 0.0   ;;  %s228_s0 = smov [#allocation5]  }
  0x15   :  { %31 = vperm.xlu0 %174, %v26_v1   ;;  %v164_v5 = vpack.c.bf16 %v43_v3, %v42_v2  ;;  %v29_v8 = vand.u32 127, %v28_v7  ;;  %s134_s1 = sshll.u32 %s228_s0, 4  ;;  %s135_s1 = int_to_ptr.vmem [resolvable:$true] %s134_s1 }
  0x16   :  { %s197_s27 = scalar_lea.vmem %s135_s1, 256  ;;  %p202_p9 = scmp.lt.s32.totalorder %s135_s1, %s135_s1 }
  0x17   :  { %165 = vmatprep.subr.bf16.mxu0 %v164_v5  ;;  %p198_p8 = scmp.ne.s32.totalorder %s135_s1, %s197_s27  ;;  %p203_p10 = scmp.lt.s32.totalorder %s197_s27, %s197_s27 }
  0x18   :  { %167 = vmatpush3.bf16.msra.mxu0 %v164_v5 }
  0x19   :  { %34 = vperm.xlu0 %174, %v27_v4   ;;  %159 = vmatprep.subr.mxu0 %v44_v6  ;;  %p204_p11 = por %p203_p10, %p202_p9 }
  0x1b   :  { %p205_p12 = pnand %p204_p11, %p198_p8 }
  0x1c   :  { %160 = vmatpush3.msra.mxu0 %v44_v6 }
  0x94   :  { %v32_v9 = vpop.permute.xlu0 %31 }
  0x95   :  { %vm36_vm1 = vcmp.eq.s32.totalorder %v29_v8, %v32_v9 }
  0x96   :  { %v146_v11 = vsel %vm36_vm1, 1.0, %v227_v10 }
  0x97   :  { %161 = vmatprep.mubr.msk.f32.mxu0 %vm45_vm0, %v146_v11 }
  0x98   :  { %v35_v12 = vpop.permute.xlu0 %34 }
  0x99   :  { %vm37_vm2 = vcmp.eq.s32.totalorder %v29_v8, %v35_v12 }
  0x9a   :  { %v147_v13 = vsel %vm37_vm2, 1.0, %v227_v10 }
  0x9b   :  { %162 = vmatmul.mubr.msk.f32.vlgmr.msra.gmra.mrb[0].mxu0 %vm45_vm0, %v147_v13 }
 0x16e   :  { %v163_v14 = vpop.f32.mrb[0].mxu0 }
 0x16f   :  { %128 = vst [vmem:[#allocation5 + $0x8] sm:$0xff] %v163_v14  ;;  %v118_v15 = vpop.f32.mrb[1].mxu0 }
 0x170   :  { %127 = vst [vmem:[#allocation5] sm:$0xff] %v118_v15 }
 0x171   :  { %208 = shalt.err (!%p205_p12)
}
 0x172   :  { %s209_s30 = scalar_lea.hbm %s282_s2, 256 }
 0x173   :  { %p210_p13 = scmp.ne.s32.totalorder %s282_s2, %s209_s30  ;;  %p213_p0 = scmp.lt.u32.totalorder %s209_s30, %s282_s2 }
 0x175   :  { %p215_p1 = pnand %p213_p0, %p210_p13 }
 0x177   :  { %218 = shalt.err (!%p215_p1)
}
 0x178   :  { %140 = dma.vmem_to_hbm [thread:$0]  %s135_s1, 256, %s282_s2, [#allocation4], %s224_s19, %s224_s19, %s225_s20  }
 0x179   :  { %221 = dma.done.wait [#allocation4], 256  }
 0x17a   :  { %222 = vsyncadd [#allocation4], 4294967040 }
 0x17b   :  { %144 = vsyncpa [#allocation3], 1 }
 0x17c   :  { %145 = vsyncpa [#allocation4], 1 }

</bundles_post_ra>
